<compile_context>
chip_gen: v7x
topology: tpu7x:2x2x1
jax: 0.10.0
libtpu: 0.0.40
codegen_flags: <defaults>
</compile_context>

<pallas_src>
import functools

import jax
import jax.numpy as jnp
from jax.experimental import pallas as pl
from jax.experimental.pallas import tpu as pltpu


def _round_up(x, m):
    return ((x + m - 1) // m) * m


@functools.lru_cache(maxsize=1)
def _tpu_vmem_and_cores():
    """Best-effort hardware query; conservative fallback (48 MiB budget, 1 core)."""
    vmem_cap = 64 << 20
    num_cores = 1
    try:
        info = pltpu.get_tpu_info()
        for name in ("vmem_capacity_bytes", "vmem_bytes", "vmem_size_bytes"):
            v = getattr(info, name, None)
            if isinstance(v, int) and v > 0:
                vmem_cap = v
                break
        for name in ("num_tensorcores", "tensorcore_count", "num_cores"):
            v = getattr(info, name, None)
            if isinstance(v, int) and v > 0:
                num_cores = v
                break
    except Exception:
        pass
    return vmem_cap, num_cores


# ----------------------------------------------------------------------------
# Kernels
# ----------------------------------------------------------------------------
def _linear_single_k_kernel(x_ref, w_ref, b_ref, o_ref):
    """Whole-K tile: o = x @ w + b. No reduction axis, no scratch."""
    wv = w_ref[...]
    xv = x_ref[...]
    if xv.dtype != wv.dtype:
        xv = xv.astype(wv.dtype)
    acc = jnp.dot(xv, wv, preferred_element_type=jnp.float32)
    o_ref[...] = (acc + b_ref[...]).astype(o_ref.dtype)


def _linear_reduce_f32_kernel(x_ref, w_ref, b_ref, o_ref):
    """K-axis reduction accumulating directly into the resident f32 output."""
    k = pl.program_id(2)

    @pl.when(k == 0)
    def _():
        o_ref[...] = jnp.zeros_like(o_ref)

    wv = w_ref[...]
    xv = x_ref[...]
    if xv.dtype != wv.dtype:
        xv = xv.astype(wv.dtype)
    o_ref[...] += jnp.dot(xv, wv, preferred_element_type=jnp.float32)

    @pl.when(k == pl.num_programs(2) - 1)
    def _():
        o_ref[...] += b_ref[...]


def _linear_reduce_acc_kernel(x_ref, w_ref, b_ref, o_ref, acc_ref):
    """K-axis reduction with an f32 scratch accumulator (non-f32 output)."""
    k = pl.program_id(2)

    @pl.when(k == 0)
    def _():
        acc_ref[...] = jnp.zeros_like(acc_ref)

    wv = w_ref[...]
    xv = x_ref[...]
    if xv.dtype != wv.dtype:
        xv = xv.astype(wv.dtype)
    acc_ref[...] += jnp.dot(xv, wv, preferred_element_type=jnp.float32)

    @pl.when(k == pl.num_programs(2) - 1)
    def _():
        o_ref[...] = (acc_ref[...] + b_ref[...]).astype(o_ref.dtype)


# ----------------------------------------------------------------------------
# Wrappers
# ----------------------------------------------------------------------------
def prepare_weight(weight, mask, compute_dtype=jnp.bfloat16):
    """One-time (parameter-load-time) preprocessing.

    Returns the pre-masked, pre-transposed (K, N) weight in the compute dtype.
    Call this once per parameter update, NOT per forward.
    """
    wt = (weight * mask.astype(weight.dtype)).T  # (K, N), lane-dense RHS
    if compute_dtype is not None:
        wt = wt.astype(compute_dtype)
    return wt


@jax.jit
def pseudo_block_sparse_linear_apply(x, wt, bias):
    """x: (..., K) -> (..., N), with wt = prepare_weight(weight, mask)."""
    orig_shape = x.shape
    K = orig_shape[-1]
    Kw, N = wt.shape
    assert Kw == K, "prepared weight K does not match input feature dim"
    assert bias.shape == (N,), "bias shape must be (out_features,)"

    x2d = x.reshape(-1, K)
    M = x2d.shape[0]
    out_dtype = x.dtype

    compute_dtype = wt.dtype
    c_item = jnp.dtype(compute_dtype).itemsize
    out_item = jnp.dtype(out_dtype).itemsize

    vmem_cap, num_cores = _tpu_vmem_and_cores()
    vmem_budget = min(vmem_cap * 3 // 4, 100 << 20)  # ~48 MiB v7x, ~96 MiB v5e/v6e

    # Sublane packing of the compute dtype: 8 (f32), 16 (bf16), 32 (int8/fp8).
    sublane = max(8, 32 // max(1, c_item))

    # --- N tiling: prefer 256-wide tiles (full v6e/v7x MXU width) unless the
    # padding waste would exceed 1/8 (v5e is natively 128-wide either way).
    tn = 128
    Np = _round_up(N, 128)
    if Np >= 256:
        Np256 = _round_up(N, 256)
        if (Np256 - N) * 8 <= Np256:
            tn, Np = 256, Np256
    grid_n = Np // tn

    # --- cast x up front only if it is re-read across several N tiles;
    # otherwise cast the tile in-kernel (VPU) and skip the HBM round trip.
    if compute_dtype != x2d.dtype and grid_n >= 3:
        x2d = x2d.astype(compute_dtype)
    x_item = jnp.dtype(x2d.dtype).itemsize

    # --- M tiling: large tm minimizes weight re-streams (weight fetched
    # Mp/tm times); keep it a multiple of the sublane packing.
    Mp_min = _round_up(M, sublane)
    if Mp_min <= 512:
        tm = Mp_min
    else:
        cands = [c for c in (512, 448, 384, 320, 256, 192, 128) if c % sublane == 0]
        tm = min(cands, key=lambda c: (_round_up(M, c), -c))

    # --- K tiling: fold K into a single tile when it fits the VMEM budget.
    Kp_full = _round_up(K, 128)

    def footprint(tm_, tn_, tk_, with_acc):
        f = 2 * (tm_ * tk_ * x_item + tk_ * tn_ * c_item)  # double-buffered inputs
        f += 2 * tn_ * 4                                    # bias tile (f32)
        f += 2 * tm_ * tn_ * out_item                       # output tile
        if with_acc:
            f += tm_ * tn_ * 4
        return f

    use_k_axis = footprint(tm, tn, Kp_full, with_acc=False) > vmem_budget
    if not use_k_axis:
        tk = Kp_full
        Kp = Kp_full
    else:
        with_acc = out_dtype != jnp.float32
        tk = Kp_full
        while footprint(tm, tn, tk, with_acc) > vmem_budget and tk > 256:
            tk = max(256, _round_up(tk // 2, 256))
        while footprint(tm, tn, tk, with_acc) > vmem_budget and tm > sublane:
            tm = max(sublane, tm // 2)
        Kp = _round_up(K, tk)

    Mp = _round_up(M, tm)
    grid_m = Mp // tm

    # --- v7x (2 TensorCores): ensure at least 2 parallel blocks when possible.
    if num_cores >= 2 and grid_m * grid_n == 1 and tn > 128:
        tn //= 2
        grid_n = Np // tn

    # --- pad operands (zero padding is benign: padded K rows/cols contribute
    # zero; padded M rows / N cols are sliced off).
    if (Mp, Kp) != (M, K):
        x2d = jnp.pad(x2d, ((0, Mp - M), (0, Kp - K)))
    wt_p = wt
    if (Kp, Np) != (K, N):
        wt_p = jnp.pad(wt_p, ((0, Kp - K), (0, Np - N)))
    bias2d = bias.astype(jnp.float32).reshape(1, N)
    if Np != N:
        bias2d = jnp.pad(bias2d, ((0, 0), (0, Np - N)))

    if not use_k_axis:
        out2d = pl.pallas_call(
            _linear_single_k_kernel,
            out_shape=jax.ShapeDtypeStruct((Mp, Np), out_dtype),
            grid_spec=pltpu.PrefetchScalarGridSpec(
                num_scalar_prefetch=0,
                grid=(grid_m, grid_n),
                in_specs=[
                    pl.BlockSpec((tm, tk), lambda i, j: (i, 0)),   # x
                    pl.BlockSpec((tk, tn), lambda i, j: (0, j)),   # masked W^T
                    pl.BlockSpec((1, tn), lambda i, j: (0, j)),    # bias
                ],
                out_specs=pl.BlockSpec((tm, tn), lambda i, j: (i, j)),
            ),
            compiler_params=pltpu.CompilerParams(
                dimension_semantics=("parallel", "parallel"),
                vmem_limit_bytes=vmem_budget,
            ),
        )(x2d, wt_p, bias2d)
    else:
        if out_dtype == jnp.float32:
            kernel = _linear_reduce_f32_kernel
            scratch = []
        else:
            kernel = _linear_reduce_acc_kernel
            scratch = [pltpu.VMEM((tm, tn), jnp.float32)]
        out2d = pl.pallas_call(
            kernel,
            out_shape=jax.ShapeDtypeStruct((Mp, Np), out_dtype),
            grid_spec=pltpu.PrefetchScalarGridSpec(
                num_scalar_prefetch=0,
                grid=(grid_m, grid_n, Kp // tk),
                in_specs=[
                    pl.BlockSpec((tm, tk), lambda i, j, k: (i, k)),  # x
                    pl.BlockSpec((tk, tn), lambda i, j, k: (k, j)),  # masked W^T
                    pl.BlockSpec((1, tn), lambda i, j, k: (0, j)),   # bias
                ],
                out_specs=pl.BlockSpec((tm, tn), lambda i, j, k: (i, j)),
                scratch_shapes=scratch,
            ),
            compiler_params=pltpu.CompilerParams(
                dimension_semantics=("parallel", "parallel", "arbitrary"),
                vmem_limit_bytes=vmem_budget,
            ),
        )(x2d, wt_p, bias2d)

    out2d = out2d[:M, :N]
    return out2d.reshape(*orig_shape[:-1], N)


def pseudo_block_sparse_linear(x, weight, mask, bias=None, *, compute_dtype=jnp.bfloat16):
    """Drop-in convenience wrapper (re-masks the weight every call).

    Prefer calling prepare_weight() once at parameter-load time and then
    pseudo_block_sparse_linear_apply() per forward.
    """
    wt = prepare_weight(weight, mask, compute_dtype=compute_dtype)
    if bias is None:
        bias = jnp.zeros((weight.shape[0],), dtype=jnp.float32)
    return pseudo_block_sparse_linear_apply(x, wt, bias)


def make_block_mask(out_features, in_features, block=32):
    """Deterministic block-sparse mask: checkerboard of (block x block) blocks."""
    nb_out = out_features // block
    nb_in = in_features // block
    blk = (jnp.arange(nb_out)[:, None] + jnp.arange(nb_in)[None, :]) % 2
    blk = blk.astype(jnp.float32)  # keep ~half the blocks
    return jnp.kron(blk, jnp.ones((block, block), dtype=jnp.float32))


if __name__ == "__main__":
    # Small shapes consistent with the module: a linear layer applied to a
    # (batch, seq, in_features) activation.
    batch, seq = 2, 8
    in_features, out_features = 128, 128

    key = jax.random.PRNGKey(0)
    kx, kw, kb = jax.random.split(key, 3)

    x = jax.random.normal(kx, (batch, seq, in_features), dtype=jnp.float32)
    weight = jax.random.normal(kw, (out_features, in_features), dtype=jnp.float32) * 0.05
    bias = jax.random.normal(kb, (out_features,), dtype=jnp.float32) * 0.1
    mask = make_block_mask(out_features, in_features, block=32)

    # Reference (same semantics as torch.nn.functional.linear with masked weight).
    ref = x @ (weight * mask).T + bias

    # Exact f32 compute path.
    wt_f32 = prepare_weight(weight, mask, compute_dtype=jnp.float32)
    out_f32 = pseudo_block_sparse_linear_apply(x, wt_f32, bias)
    out_f32 = jax.block_until_ready(out_f32)
    assert out_f32.shape == (batch, seq, out_features)
    assert jnp.allclose(out_f32, ref, atol=1e-4, rtol=1e-4), "f32 mismatch vs reference"

    # Default bf16-operand path (f32 accumulation), weight prepared once.
    wt_bf16 = prepare_weight(weight, mask)  # bf16 default
    out_bf16 = pseudo_block_sparse_linear_apply(x, wt_bf16, bias)
    out_bf16 = jax.block_until_ready(out_bf16)
    assert out_bf16.shape == (batch, seq, out_features)
    assert jnp.allclose(out_bf16, ref, atol=2e-2, rtol=2e-2), "bf16 mismatch vs reference"

    print("KERNEL_OK")
</pallas_src>

<mosaic_0001>
module attributes {stable_mosaic.version = 11 : i64} {
  func.func @_linear_single_k_kernel(%arg0: i32, %arg1: i32, %arg2: memref<16x128xf32, #tpu.memory_space<vmem>>, %arg3: memref<128x128xf32, #tpu.memory_space<vmem>>, %arg4: memref<1x128xf32, #tpu.memory_space<vmem>>, %arg5: memref<16x128xf32, #tpu.memory_space<vmem>>) attributes {dimension_semantics = [#tpu.dimension_semantics<parallel>, #tpu.dimension_semantics<parallel>], iteration_bounds = array<i64: 1, 1>, scalar_prefetch = 0 : i64, scratch_operands = 0 : i64, tpu.core_type = #tpu.core_type<tc>, window_params = [{transform_indices = @transform_0, window_bounds = array<i64: 16, 128>}, {transform_indices = @transform_1, window_bounds = array<i64: 128, 128>}, {transform_indices = @transform_2, window_bounds = array<i64: 1, 128>}, {transform_indices = @transform_3, window_bounds = array<i64: 16, 128>}]} {
    %c0 = arith.constant 0 : index
    %c0_0 = arith.constant 0 : index
    %0 = vector.load %arg3[%c0, %c0_0] : memref<128x128xf32, #tpu.memory_space<vmem>>, vector<128x128xf32>
    %c0_1 = arith.constant 0 : index
    %c0_2 = arith.constant 0 : index
    %1 = vector.load %arg2[%c0_1, %c0_2] : memref<16x128xf32, #tpu.memory_space<vmem>>, vector<16x128xf32>
    %cst = arith.constant dense<0.000000e+00> : vector<16x128xf32>
    %2 = tpu.matmul %1, %0, %cst {dimension_numbers = #tpu.dot_dimension_numbers<[1], [0], [0], [1], [0, 0, 1, 1], [], []>} : vector<16x128xf32>, vector<128x128xf32>, vector<16x128xf32> -> vector<16x128xf32>
    %c0_3 = arith.constant 0 : index
    %c0_4 = arith.constant 0 : index
    %3 = vector.load %arg4[%c0_3, %c0_4] : memref<1x128xf32, #tpu.memory_space<vmem>>, vector<1x128xf32>
    %4 = vector.broadcast %3 : vector<1x128xf32> to vector<16x128xf32>
    %5 = arith.addf %2, %4 : vector<16x128xf32>
    %c0_5 = arith.constant 0 : index
    %c0_6 = arith.constant 0 : index
    %6 = vector.load %arg5[%c0_5, %c0_6] : memref<16x128xf32, #tpu.memory_space<vmem>>, vector<16x128xf32>
    tpu.vector_store %arg5[%c0_5, %c0_6], %5 {strides = array<i32>} : memref<16x128xf32, #tpu.memory_space<vmem>>, vector<16x128xf32>,
    return
  }
  func.func @transform_0(%arg0: i32, %arg1: i32) -> (i32, i32) {
    %c0_i32 = arith.constant 0 : i32
    %c0_i32_0 = arith.constant 0 : i32
    return %arg0, %c0_i32 : i32, i32
  }
  func.func @transform_1(%arg0: i32, %arg1: i32) -> (i32, i32) {
    %c0_i32 = arith.constant 0 : i32
    %c0_i32_0 = arith.constant 0 : i32
    return %c0_i32, %arg1 : i32, i32
  }
  func.func @transform_2(%arg0: i32, %arg1: i32) -> (i32, i32) {
    %c0_i32 = arith.constant 0 : i32
    %c0_i32_0 = arith.constant 0 : i32
    return %c0_i32, %arg1 : i32, i32
  }
  func.func @transform_3(%arg0: i32, %arg1: i32) -> (i32, i32) {
    %c0_i32 = arith.constant 0 : i32
    return %arg0, %arg1 : i32, i32
  }
}

</mosaic_0001>

<bundles_post_ra>
// kernel: pseudo_block_sparse_linear_apply.1
= control target key start
LH: loop header
LB: loop body
LE: loop exit
PB: predicated region body
PF: predicated region fallthrough
CT: control target
= control target key end

     0   :  { %8 = vsyncpa [#allocation3], 0  ;;  %s399_s0 = inlined_call_operand.hbm [shape: f32[16,128], index: 0, kind: input, shape index: {}]   ;;  %s400_s1 = inlined_call_operand.hbm [shape: f32[128,128], index: 1, kind: input, shape index: {}]   ;;  %s401_s2 = inlined_call_operand.vmem [shape: f32[1,128], index: 2, kind: input, shape index: {}]   ;;  %s402_s3 = inlined_call_operand.hbm [shape: f32[16,128], index: 3, kind: output, shape index: {}]  }
   0x1   :  { %9 = vsyncpa [#allocation6], 0 }
   0x2   :  { %10 = vsyncpa [#allocation4], 0  ;;  %s326_s12 = smov [#allocation2]   ;;  %s254_s16 = scalar_lea.hbm %s399_s0, 256 }
   0x3   :  { %s16_s13 = sshll.u32 %s326_s12, 4  ;;  %p255_p0 = scmp.ne.s32.totalorder %s399_s0, %s254_s16  ;;  %s17_s13 = int_to_ptr.vmem [resolvable:$true] %s16_s13 }
   0x4   :  { %p258_p1 = scmp.lt.u32.totalorder %s254_s16, %s399_s0 }
   0x6   :  { %p260_p2 = pnand %p258_p1, %p255_p0 }
   0x8   :  { %263 = shalt.err (!%p260_p2)
}
   0x9   :  { %s264_s21 = scalar_lea.vmem %s17_s13, 256  ;;  %p269_p4 = scmp.lt.s32.totalorder %s17_s13, %s17_s13 }
   0xa   :  { %p265_p3 = scmp.ne.s32.totalorder %s17_s13, %s264_s21  ;;  %p270_p5 = scmp.lt.s32.totalorder %s264_s21, %s264_s21 }
   0xc   :  { %p271_p6 = por %p270_p5, %p269_p4 }
   0xe   :  { %p272_p7 = pnand %p271_p6, %p265_p3 }
  0x10   :  { %275 = shalt.err (!%p272_p7)
}
  0x11   :  { %s327_s22 = smov 128   ;;  %s328_s23 = smov 8  }
  0x12   :  { %22 = dma.hbm_to_vmem [thread:$0]  %s399_s0, 256, %s17_s13, [#allocation3], %s327_s22, %s327_s22, %s328_s23  }
  0x13   :  { %s329_s26 = smov [#allocation5]   ;;  %s276_s30 = scalar_lea.hbm %s400_s1, 2048 }
  0x14   :  { %s28_s27 = sshll.u32 %s329_s26, 4  ;;  %p277_p8 = scmp.ne.s32.totalorder %s400_s1, %s276_s30  ;;  %s29_s27 = int_to_ptr.vmem [resolvable:$true] %s28_s27 }
  0x15   :  { %p280_p9 = scmp.lt.u32.totalorder %s276_s30, %s400_s1 }
  0x17   :  { %p282_p10 = pnand %p280_p9, %p277_p8 }
  0x19   :  { %285 = shalt.err (!%p282_p10)
}
  0x1a   :  { %s286_s8 = scalar_lea.vmem %s29_s27, 2048  ;;  %p291_p12 = scmp.lt.s32.totalorder %s29_s27, %s29_s27 }
  0x1b   :  { %p287_p11 = scmp.ne.s32.totalorder %s29_s27, %s286_s8  ;;  %p292_p13 = scmp.lt.s32.totalorder %s286_s8, %s286_s8 }
  0x1d   :  { %p293_p0 = por %p292_p13, %p291_p12 }
  0x1f   :  { %p294_p1 = pnand %p293_p0, %p287_p11 }
  0x21   :  { %297 = shalt.err (!%p294_p1)
}
  0x22   :  { %34 = dma.hbm_to_vmem [thread:$0]  %s400_s1, 2048, %s29_s27, [#allocation6], %s327_s22, %s327_s22, %s328_s23  }
  0x23   :  { %320 = dma.done.wait [#allocation3], 256  }
  0x24   :  { %321 = vsyncadd [#allocation3], 4294967040 }
  0x25   :  { %322 = dma.done.wait [#allocation6], 2048  }
  0x26   :  { %323 = vsyncadd [#allocation6], 4294965248  ;;  %v43_v0 = vld [vmem:[#allocation5] sm:$0xff]  ;;  %v44_v1 = vld [vmem:[#allocation5 + $0x8] sm:$0xff]  ;;  %s330_s11 = smov [#allocation7]  }
  0x27   :  { %v45_v2 = vld [vmem:[#allocation5 + $0x10] sm:$0xff]  ;;  %v217_v3 = vpack.c.bf16 %v44_v1, %v43_v0  ;;  %v46_v4 = vld [vmem:[#allocation5 + $0x18] sm:$0xff]  ;;  %v47_v6 = vld [vmem:[#allocation5 + $0x20] sm:$0xff]  ;;  %s150_s12 = sshll.u32 %s330_s11, 4  ;;  %s151_s12 = int_to_ptr.vmem [resolvable:$true] %s150_s12 }
  0x28   :  { %v221_v5 = vpack.c.bf16 %v46_v4, %v45_v2  ;;  %v48_v7 = vld [vmem:[#allocation5 + $0x28] sm:$0xff]  ;;  %v59_v9 = vld [vmem:[#allocation2] sm:$0xff]  ;;  %v50_v11 = vld [vmem:[#allocation5 + $0x38] sm:$0xff]  ;;  %s298_s13 = scalar_lea.vmem %s151_s12, 256  ;;  %p303_p3 = scmp.lt.s32.totalorder %s151_s12, %s151_s12 }
  0x29   :  { %218 = vmatprep.subr.bf16.mxu0 %v217_v3  ;;  %v225_v8 = vpack.c.bf16 %v48_v7, %v47_v6  ;;  %v49_v10 = vld [vmem:[#allocation5 + $0x30] sm:$0xff]  ;;  %214 = vmatprep.mubr.f32.mxu0 %v59_v9  ;;  %v51_v13 = vld [vmem:[#allocation5 + $0x40] sm:$0xff]  ;;  %v52_v14 = vld [vmem:[#allocation5 + $0x48] sm:$0xff]  ;;  %p299_p2 = scmp.ne.s32.totalorder %s151_s12, %s298_s13  ;;  %p304_p4 = scmp.lt.s32.totalorder %s298_s13, %s298_s13 }
  0x2a   :  { %220 = vmatpush3.bf16.msra.mxu0 %v217_v3  ;;  %v229_v12 = vpack.c.bf16 %v50_v11, %v49_v10  ;;  %v233_v15 = vpack.c.bf16 %v52_v14, %v51_v13  ;;  %v53_v16 = vld [vmem:[#allocation5 + $0x50] sm:$0xff]  ;;  %v54_v17 = vld [vmem:[#allocation5 + $0x58] sm:$0xff]  ;;  %v55_v19 = vld [vmem:[#allocation5 + $0x60] sm:$0xff] }
  0x2b   :  { %222 = vmatprep.subr.bf16.mxu0 %v221_v5  ;;  %v237_v18 = vpack.c.bf16 %v54_v17, %v53_v16  ;;  %v56_v20 = vld [vmem:[#allocation5 + $0x68] sm:$0xff]  ;;  %v57_v22 = vld [vmem:[#allocation5 + $0x70] sm:$0xff]  ;;  %v58_v23 = vld [vmem:[#allocation5 + $0x78] sm:$0xff]  ;;  %p305_p5 = por %p304_p4, %p303_p3 }
  0x2c   :  { %v241_v21 = vpack.c.bf16 %v56_v20, %v55_v19  ;;  %v245_v24 = vpack.c.bf16 %v58_v23, %v57_v22  ;;  %v60_v25 = vld [vmem:[#allocation2 + $0x8] sm:$0xff]  ;;  %v163_v26 = vld [vmem:[%s401_s2] ss:$0 sm:$0xff] }
  0x2d   :  { %p306_p6 = pnand %p305_p5, %p299_p2 }
  0x2e   :  { %224 = vmatpush3.bf16.msra.mxu0 %v221_v5 }
  0x2f   :  { %226 = vmatprep.subr.bf16.mxu0 %v225_v8 }
  0x32   :  { %228 = vmatpush3.bf16.msra.mxu0 %v225_v8 }
  0x33   :  { %230 = vmatprep.subr.bf16.mxu0 %v229_v12 }
  0x36   :  { %232 = vmatpush3.bf16.msra.mxu0 %v229_v12 }
  0x37   :  { %234 = vmatprep.subr.bf16.mxu0 %v233_v15 }
  0x3a   :  { %236 = vmatpush3.bf16.msra.mxu0 %v233_v15 }
  0x3b   :  { %238 = vmatprep.subr.bf16.mxu0 %v237_v18 }
  0x3e   :  { %240 = vmatpush3.bf16.msra.mxu0 %v237_v18 }
  0x3f   :  { %242 = vmatprep.subr.bf16.mxu0 %v241_v21 }
  0x42   :  { %244 = vmatpush3.bf16.msra.mxu0 %v241_v21 }
  0x43   :  { %246 = vmatprep.subr.bf16.mxu0 %v245_v24 }
  0x46   :  { %248 = vmatpush3.bf16.msra.mxu0 %v245_v24 }
  0x49   :  { %215 = vmatmul.mubr.f32.vlgmr.msra.gmra.mrb[0].mxu0 %v60_v25 }
 0x11c   :  { %v216_v27 = vpop.f32.mrb[0].mxu0 }
 0x11d   :  { %v140_v28 = vadd.f32 %v216_v27, %v163_v26  ;;  %v134_v29 = vpop.f32.mrb[1].mxu0 }
 0x11e   :  { %v135_v30 = vadd.f32 %v163_v26, %v134_v29 }
 0x11f   :  { %144 = vst [vmem:[#allocation7 + $0x8] sm:$0xff] %v140_v28 }
 0x120   :  { %143 = vst [vmem:[#allocation7] sm:$0xff] %v135_v30 }
 0x121   :  { %309 = shalt.err (!%p306_p6)
}
 0x122   :  { %s310_s2 = scalar_lea.hbm %s402_s3, 256 }
 0x123   :  { %p311_p7 = scmp.ne.s32.totalorder %s402_s3, %s310_s2  ;;  %p314_p8 = scmp.lt.u32.totalorder %s310_s2, %s402_s3 }
 0x125   :  { %p316_p9 = pnand %p314_p8, %p311_p7 }
 0x127   :  { %319 = shalt.err (!%p316_p9)
}
 0x128   :  { %156 = dma.vmem_to_hbm [thread:$0]  %s151_s12, 256, %s402_s3, [#allocation4], %s327_s22, %s327_s22, %s328_s23  }
 0x129   :  { %324 = dma.done.wait [#allocation4], 256  }
 0x12a   :  { %325 = vsyncadd [#allocation4], 4294967040 }
 0x12b   :  { %160 = vsyncpa [#allocation3], 1 }
 0x12c   :  { %161 = vsyncpa [#allocation6], 1 }
 0x12d   :  { %162 = vsyncpa [#allocation4], 1 }

</bundles_post_ra>
